<compile_context>
chip_gen: v7x
topology: tpu7x:2x2x1
jax: 0.10.0
libtpu: 0.0.40
codegen_flags: <defaults>
</compile_context>

<pallas_src>
import functools

import jax
import jax.numpy as jnp
from jax.experimental import pallas as pl
from jax.experimental.pallas import tpu as pltpu


def _multitask_head_kernel(x_ref, halo_ref, w1t_ref, b1_ref, w2t_ref, b2_ref,
                           out_ref, *, W, TH):
    # x_ref   : (1, C, TH*W)   f32   TH image rows (flattened) of one sample
    # halo_ref: (1, 1, C, 2*W) f32   [row above | row below] this row block
    # w1t_ref : (MT, 9*C)      bf16  fused 3x3 weights, col = (3*ky+kx)*C + c
    # b1_ref  : (MT, 1)        f32
    # w2t_ref : (KT, MT)       bf16  block-diagonal (fused heads) 1x1 weights^T
    # b2_ref  : (KT, 1)        f32
    # out_ref : (1, KT, TH*W)  f32   NCHW-flattened output rows (lane-dense)
    C = x_ref.shape[1]
    MT = w1t_ref.shape[0]
    KT = w2t_ref.shape[0]
    THW = TH * W
    Lp = (TH + 2) * W                      # halo-padded tile, flattened length
    Lr = Lp + (-Lp) % 128                  # round up so the lane rotations act
                                           # on a 128-aligned width (Lr == Lp
                                           # whenever W % 128 == 0)

    body = x_ref[0]                        # (C, THW) f32
    halo = halo_ref[0, 0]                  # (C, 2W)  f32
    parts = [halo[:, :W], body, halo[:, W:]]
    if Lr > Lp:
        parts.append(jnp.zeros((C, Lr - Lp), jnp.float32))
    xpad = jnp.concatenate(parts, axis=1)  # (C, Lr) f32, rows [-1 .. TH]

    # x coordinate of every flattened position; the +/-1 lane rotations wrap
    # across row boundaries exactly at these columns, which is also where the
    # conv's zero padding in x must appear.
    col_x = jax.lax.broadcasted_iota(jnp.int32, (1, Lr), 1) % W

    # Two XLU lane rotations give every (y, x-1) / (y, x+1) value; the masks
    # zero the per-row wrap column.  Kept in f32 (v5e VPU has no bf16); each
    # tap source is cast to bf16 exactly once below.
    x_m = jnp.where(col_x > 0, pltpu.roll(xpad, 1, axis=1), 0.0)           # x-1
    x_p = jnp.where(col_x < W - 1, pltpu.roll(xpad, Lr - 1, axis=1), 0.0)  # x+1

    srcs = (x_m.astype(jnp.bfloat16),      # ox = -1
            xpad.astype(jnp.bfloat16),     # ox =  0
            x_p.astype(jnp.bfloat16))      # ox = +1

    # conv1 of every head: 9 accumulating K=C matmuls (no materialised im2col).
    # Row offsets (1+oy)*W are static and 128-aligned whenever W % 128 == 0.
    acc = jnp.zeros((MT, THW), jnp.float32)
    for k in range(9):                     # static unroll over the 3x3 taps
        oy, ox = k // 3 - 1, k % 3 - 1
        row0 = (1 + oy) * W
        tap = srcs[ox + 1][:, row0:row0 + THW]               # (C, THW) bf16
        acc = acc + jnp.dot(w1t_ref[:, k * C:(k + 1) * C], tap,
                            preferred_element_type=jnp.float32)

    h = jnp.maximum(acc + b1_ref[...], 0.0)                  # bias + ReLU, f32

    # per-head 1x1 convs + channel concat == one block-diagonal matmul.
    out = jnp.dot(w2t_ref[...], h.astype(jnp.bfloat16),
                  preferred_element_type=jnp.float32) + b2_ref[...]
    out_ref[...] = out.reshape(1, KT, THW).astype(out_ref.dtype)


def _pick_vmem_limit():
    """Per-generation scoped-VMEM request (~48 MiB on v7x, 96 MiB on v5e/v6e)."""
    try:
        cap = int(pltpu.get_tpu_info().vmem_capacity_bytes)
        return int(min(cap * 3 // 4, 96 * 1024 * 1024))
    except Exception:
        return 48 * 1024 * 1024            # safe on every generation


def _tile_vmem_bytes(C, TH, W, MT, KT):
    """Rough per-step VMEM working set for row-block size TH."""
    thw = TH * W
    lp = (TH + 2) * W
    lr = lp + (-lp) % 128
    b = 2 * C * thw * 4                    # x body tile (double-buffered, f32)
    b += 2 * C * 2 * W * 4                 # halo rows   (double-buffered, f32)
    b += 2 * KT * thw * 4                  # output tile (double-buffered, f32)
    b += 3 * C * lr * 4                    # padded tile + 2 rolled copies (f32)
    b += 3 * C * lr * 2                    # bf16 tap sources
    b += 2 * MT * thw * 4                  # conv1 accumulator + ReLU result
    b += KT * thw * 4                      # conv2 result
    b += 2 * ((MT * 9 * C + KT * MT) * 2 + (MT + KT) * 4)   # weights / biases
    return b


def _pick_row_block(H, W, C, MT, KT, budget):
    """Largest row block TH (divisor of H) whose working set fits `budget`,
    preferring lane-dense tiles (TH*W % 128 == 0) and at least 2 row blocks."""
    divisors = [d for d in range(1, H + 1) if H % d == 0]
    lane_ok = [d for d in divisors if (d * W) % 128 == 0 or d == H]
    for cand in (
        [d for d in lane_ok if d < H and _tile_vmem_bytes(C, d, W, MT, KT) <= budget],
        [d for d in lane_ok if _tile_vmem_bytes(C, d, W, MT, KT) <= budget],
        [d for d in divisors if _tile_vmem_bytes(C, d, W, MT, KT) <= budget],
    ):
        if cand:
            return max(cand)
    return min(lane_ok)                    # nothing fits: smallest legal tile


def multitask_head_forward(x_nchw, w1t, b1, w2t, b2, *, row_block=None):
    """x_nchw: (N, C, H, W) float32.  Returns (N, KT, H, W) float32."""
    N, C, H, W = x_nchw.shape
    MT = w1t.shape[0]
    KT = w2t.shape[0]

    vmem_limit = _pick_vmem_limit()
    TH = row_block if row_block is not None else _pick_row_block(
        H, W, C, MT, KT, vmem_limit // 2)
    assert H % TH == 0, (H, TH)
    T = H // TH
    THW = TH * W
    assert T == 1 or THW % 128 == 0, (
        "row block must give lane-dense tiles (TH*W % 128 == 0)")

    x_flat = x_nchw.reshape(N, C, H * W)   # contiguous reshape: no data movement

    # Halo rows for every row block: [row above | row below] per (n, t); zeros
    # at the true image edges, real neighbour rows at interior block
    # boundaries.  Only 2/TH of the image is re-read through this side input.
    zero_row = jnp.zeros((N, C, 1, W), x_nchw.dtype)
    above = jnp.concatenate([zero_row, x_nchw[:, :, TH - 1:H - 1:TH, :]], axis=2)
    below = jnp.concatenate([x_nchw[:, :, TH::TH, :], zero_row], axis=2)
    halo = jnp.transpose(jnp.concatenate([above, below], axis=3), (0, 2, 1, 3))
    # halo: (N, T, C, 2*W)

    flops = 2 * N * H * W * (9 * C * MT + MT * KT)
    bytes_accessed = ((x_flat.size + halo.size + N * KT * H * W) * 4
                      + (w1t.size + w2t.size) * 2 + (b1.size + b2.size) * 4)

    out = pl.pallas_call(
        functools.partial(_multitask_head_kernel, W=W, TH=TH),
        out_shape=jax.ShapeDtypeStruct((N, KT, H * W), jnp.float32),
        grid_spec=pltpu.PrefetchScalarGridSpec(
            num_scalar_prefetch=0,
            grid=(N, T),
            in_specs=[
                pl.BlockSpec((1, C, THW), lambda n, t: (n, 0, t)),
                pl.BlockSpec((1, 1, C, 2 * W), lambda n, t: (n, t, 0, 0)),
                # Constant operands: index maps never change, so Pallas fetches
                # them once.  TODO(synk): single-buffer them via
                # pipeline_mode=pl.Buffered(1) to reclaim their second VMEM
                # buffer at production sizes (C=256, MT=192).
                pl.BlockSpec((MT, 9 * C), lambda n, t: (0, 0)),
                pl.BlockSpec((MT, 1), lambda n, t: (0, 0)),
                pl.BlockSpec((KT, MT), lambda n, t: (0, 0)),
                pl.BlockSpec((KT, 1), lambda n, t: (0, 0)),
            ],
            out_specs=pl.BlockSpec((1, KT, THW), lambda n, t: (n, 0, t)),
        ),
        compiler_params=pltpu.CompilerParams(
            dimension_semantics=("parallel", "parallel"),
            vmem_limit_bytes=vmem_limit,
        ),
        cost_estimate=pl.CostEstimate(flops=flops, transcendentals=0,
                                      bytes_accessed=bytes_accessed),
    )(x_flat, halo, w1t, b1, w2t, b2)

    return out.reshape(N, KT, H, W)        # contiguous reshape: stays NCHW


def make_params(key, input_channels, head_sizes):
    """Deterministic synthetic weights (shapes per MultitaskHead.__init__)."""
    C = input_channels
    m = C // 4
    n_heads = len(head_sizes)
    MT = m * n_heads
    KT = sum(head_sizes)

    per_head = []
    keys = jax.random.split(key, 4 * n_heads)
    for i, oc in enumerate(head_sizes):
        k1, k2, k3, k4 = keys[4 * i: 4 * i + 4]
        w1 = jax.random.normal(k1, (3, 3, C, m), jnp.float32) * 0.1   # HWIO
        b1 = jax.random.normal(k2, (m,), jnp.float32) * 0.1
        w2 = jax.random.normal(k3, (m, oc), jnp.float32) * 0.1
        b2 = jax.random.normal(k4, (oc,), jnp.float32) * 0.1
        per_head.append((w1, b1, w2, b2))

    # Fused / pre-transposed weights in the layout the kernel expects.
    w1_all = jnp.concatenate([p[0] for p in per_head], axis=-1)       # (3,3,C,MT)
    w1t = w1_all.reshape(9 * C, MT).T.astype(jnp.bfloat16)            # (MT, 9*C)
    b1_all = jnp.concatenate([p[1] for p in per_head]).reshape(MT, 1)
    w2_block = jnp.zeros((MT, KT), jnp.float32)
    off = 0
    for i, (_, _, w2, _) in enumerate(per_head):
        oc = w2.shape[1]
        w2_block = w2_block.at[i * m:(i + 1) * m, off:off + oc].set(w2)
        off += oc
    w2t = w2_block.T.astype(jnp.bfloat16)                             # (KT, MT)
    b2_all = jnp.concatenate([p[3] for p in per_head]).reshape(KT, 1)
    return per_head, (w1t, b1_all, w2t, b2_all)


def reference_forward(x_nchw, per_head):
    """Pure-JAX f32 reference matching the PyTorch module."""
    x = jnp.transpose(x_nchw, (0, 2, 3, 1))  # NHWC (reference only)
    outs = []
    for (w1, b1, w2, b2) in per_head:
        h = jax.lax.conv_general_dilated(
            x, w1, (1, 1), "SAME",
            dimension_numbers=("NHWC", "HWIO", "NHWC")) + b1
        h = jnp.maximum(h, 0.0)
        o = jax.lax.conv_general_dilated(
            h, w2.reshape(1, 1, *w2.shape), (1, 1), "SAME",
            dimension_numbers=("NHWC", "HWIO", "NHWC")) + b2
        outs.append(o)
    y = jnp.concatenate(outs, axis=-1)
    return jnp.transpose(y, (0, 3, 1, 2))


if __name__ == "__main__":
    # Config consistent with the module (M.head_size = [[2], [1], [2]]):
    # per-head output channels [2, 1, 2], num_class = 5, m = C_in // 4 = 4.
    input_channels = 16
    head_sizes = [2, 1, 2]
    N, H, W = 2, 16, 16

    key = jax.random.PRNGKey(0)
    kx, kp = jax.random.split(key)
    x = jax.random.normal(kx, (N, input_channels, H, W), jnp.float32)

    per_head, fused = make_params(kp, input_channels, head_sizes)

    # row_block=8 -> two row blocks per image (TH*W = 128, lane-dense) so the
    # interior-halo path (real neighbour rows) is exercised, not just the
    # zero-padded image edges.
    out = multitask_head_forward(x, *fused, row_block=8)
    out = jax.block_until_ready(out)

    ref = reference_forward(x, per_head)
    assert out.shape == (N, sum(head_sizes), H, W), out.shape
    err = jnp.abs(out - ref)
    # bf16 MXU operands vs the f32 reference: loose absolute max bound plus a
    # tight mean bound.  TODO(synk): re-validate tolerances at C=256 (longer K).
    assert float(err.max()) < 1e-1 and float(err.mean()) < 2e-2, (
        float(err.max()), float(err.mean()))

    print("KERNEL_OK")
</pallas_src>

<mosaic_0001>
module attributes {stable_mosaic.version = 11 : i64} {
  func.func @_multitask_head_kernel(%arg0: i32, %arg1: i32, %arg2: memref<1x16x128xf32, #tpu.memory_space<vmem>>, %arg3: memref<1x1x16x32xf32, #tpu.memory_space<vmem>>, %arg4: memref<12x144xbf16, #tpu.memory_space<vmem>>, %arg5: memref<12x1xf32, #tpu.memory_space<vmem>>, %arg6: memref<5x12xbf16, #tpu.memory_space<vmem>>, %arg7: memref<5x1xf32, #tpu.memory_space<vmem>>, %arg8: memref<1x5x128xf32, #tpu.memory_space<vmem>>) attributes {dimension_semantics = [#tpu.dimension_semantics<parallel>, #tpu.dimension_semantics<parallel>], iteration_bounds = array<i64: 2, 2>, scalar_prefetch = 0 : i64, scratch_operands = 0 : i64, tpu.core_type = #tpu.core_type<tc>, window_params = [{transform_indices = @transform_0, window_bounds = array<i64: 1, 16, 128>}, {transform_indices = @transform_1, window_bounds = array<i64: 1, 1, 16, 32>}, {pipeline_mode = #tpu.pipeline_mode<synchronous>, transform_indices = @transform_2, window_bounds = array<i64: 12, 144>}, {pipeline_mode = #tpu.pipeline_mode<synchronous>, transform_indices = @transform_3, window_bounds = array<i64: 12, 1>}, {pipeline_mode = #tpu.pipeline_mode<synchronous>, transform_indices = @transform_4, window_bounds = array<i64: 5, 12>}, {pipeline_mode = #tpu.pipeline_mode<synchronous>, transform_indices = @transform_5, window_bounds = array<i64: 5, 1>}, {transform_indices = @transform_6, window_bounds = array<i64: 1, 5, 128>}]} {
    %c0 = arith.constant 0 : index
    %c0_0 = arith.constant 0 : index
    %c0_1 = arith.constant 0 : index
    %0 = vector.load %arg2[%c0, %c0_0, %c0_1] : memref<1x16x128xf32, #tpu.memory_space<vmem>>, vector<1x16x128xf32>
    %1 = vector.shape_cast %0 : vector<1x16x128xf32> to vector<16x128xf32>
    %c0_2 = arith.constant 0 : index
    %c0_3 = arith.constant 0 : index
    %c0_4 = arith.constant 0 : index
    %c0_5 = arith.constant 0 : index
    %2 = vector.load %arg3[%c0_2, %c0_3, %c0_4, %c0_5] : memref<1x1x16x32xf32, #tpu.memory_space<vmem>>, vector<1x1x16x32xf32>
    %3 = vector.shape_cast %2 : vector<1x1x16x32xf32> to vector<16x32xf32>
    %4 = vector.extract_strided_slice %3 {offsets = [0, 0], sizes = [16, 16], strides = [1, 1]} : vector<16x32xf32> to vector<16x16xf32>
    %5 = vector.extract_strided_slice %3 {offsets = [0, 16], sizes = [16, 16], strides = [1, 1]} : vector<16x32xf32> to vector<16x16xf32>
    %cst = arith.constant 0.000000e+00 : f32
    %6 = vector.broadcast %cst : f32 to vector<16x96xf32>
    %7 = tpu.concatenate %4, %1, %5, %6 in 1 : vector<16x16xf32>, vector<16x128xf32>, vector<16x16xf32>, vector<16x96xf32> -> vector<16x256xf32>
    %8 = tpu.iota {dimensions = array<i32: 1>} : vector<1x256xi32>
    %c16_i32 = arith.constant 16 : i32
    %c0_i32 = arith.constant 0 : i32
    %9 = arith.cmpi eq, %c16_i32, %c0_i32 : i32
    %c1_i32 = arith.constant 1 : i32
    %10 = arith.select %9, %c1_i32, %c16_i32 : i32
    %11 = vector.broadcast %10 : i32 to vector<1x256xi32>
    %12 = arith.remsi %8, %11 : vector<1x256xi32>
    %c0_i32_6 = arith.constant 0 : i32
    %13 = vector.broadcast %c0_i32_6 : i32 to vector<1x256xi32>
    %14 = arith.cmpi ne, %12, %13 : vector<1x256xi32>
    %c0_i32_7 = arith.constant 0 : i32
    %15 = vector.broadcast %c0_i32_7 : i32 to vector<1x256xi32>
    %16 = arith.cmpi slt, %12, %15 : vector<1x256xi32>
    %c0_i32_8 = arith.constant 0 : i32
    %17 = arith.cmpi slt, %10, %c0_i32_8 : i32
    %18 = vector.broadcast %17 : i1 to vector<1x256xi1>
    %19 = vector.broadcast %18 : vector<1x256xi1> to vector<1x256xi1>
    %20 = arith.xori %16, %19 : vector<1x256xi1>
    %21 = arith.andi %20, %14 : vector<1x256xi1>
    %22 = vector.broadcast %10 : i32 to vector<1x256xi32>
    %23 = arith.addi %12, %22 : vector<1x256xi32>
    %24 = arith.select %21, %23, %12 : vector<1x256xi1>, vector<1x256xi32>
    %c0_i32_9 = arith.constant 0 : i32
    %25 = vector.broadcast %c0_i32_9 : i32 to vector<1x256xi32>
    %26 = arith.cmpi sgt, %24, %25 : vector<1x256xi32>
    %c1_i32_10 = arith.constant 1 : i32
    %27 = tpu.dynamic_rotate %7 by %c1_i32_10 dim 1 : vector<16x256xf32>, i32 -> vector<16x256xf32>
    %cst_11 = arith.constant 0.000000e+00 : f32
    %28 = vector.shape_cast %26 : vector<1x256xi1> to vector<1x256xi1>
    %29 = vector.broadcast %28 : vector<1x256xi1> to vector<16x256xi1>
    %30 = vector.broadcast %cst_11 : f32 to vector<16x256xf32>
    %31 = arith.select %29, %27, %30 : vector<16x256xi1>, vector<16x256xf32>
    %c15_i32 = arith.constant 15 : i32
    %32 = vector.broadcast %c15_i32 : i32 to vector<1x256xi32>
    %33 = arith.cmpi slt, %24, %32 : vector<1x256xi32>
    %c255_i32 = arith.constant 255 : i32
    %34 = tpu.dynamic_rotate %7 by %c255_i32 dim 1 : vector<16x256xf32>, i32 -> vector<16x256xf32>
    %cst_12 = arith.constant 0.000000e+00 : f32
    %35 = vector.shape_cast %33 : vector<1x256xi1> to vector<1x256xi1>
    %36 = vector.broadcast %35 : vector<1x256xi1> to vector<16x256xi1>
    %37 = vector.broadcast %cst_12 : f32 to vector<16x256xf32>
    %38 = arith.select %36, %34, %37 : vector<16x256xi1>, vector<16x256xf32>
    %39 = arith.truncf %31 : vector<16x256xf32> to vector<16x256xbf16>
    %40 = arith.truncf %7 : vector<16x256xf32> to vector<16x256xbf16>
    %41 = arith.truncf %38 : vector<16x256xf32> to vector<16x256xbf16>
    %cst_13 = arith.constant 0.000000e+00 : f32
    %42 = vector.broadcast %cst_13 : f32 to vector<12x128xf32>
    %43 = vector.extract_strided_slice %39 {offsets = [0, 0], sizes = [16, 128], strides = [1, 1]} : vector<16x256xbf16> to vector<16x128xbf16>
    %c0_14 = arith.constant 0 : index
    %c0_15 = arith.constant 0 : index
    %44 = vector.load %arg4[%c0_14, %c0_15] : memref<12x144xbf16, #tpu.memory_space<vmem>>, vector<12x16xbf16>
    %cst_16 = arith.constant dense<0.000000e+00> : vector<12x128xf32>
    %45 = tpu.matmul %44, %43, %cst_16 {dimension_numbers = #tpu.dot_dimension_numbers<[1], [0], [0], [1], [0, 0, 1, 1], [], []>} : vector<12x16xbf16>, vector<16x128xbf16>, vector<12x128xf32> -> vector<12x128xf32>
    %46 = arith.addf %42, %45 : vector<12x128xf32>
    %47 = vector.extract_strided_slice %40 {offsets = [0, 0], sizes = [16, 128], strides = [1, 1]} : vector<16x256xbf16> to vector<16x128xbf16>
    %c0_17 = arith.constant 0 : index
    %c16 = arith.constant 16 : index
    %48 = vector.load %arg4[%c0_17, %c16] : memref<12x144xbf16, #tpu.memory_space<vmem>>, vector<12x16xbf16>
    %cst_18 = arith.constant dense<0.000000e+00> : vector<12x128xf32>
    %49 = tpu.matmul %48, %47, %cst_18 {dimension_numbers = #tpu.dot_dimension_numbers<[1], [0], [0], [1], [0, 0, 1, 1], [], []>} : vector<12x16xbf16>, vector<16x128xbf16>, vector<12x128xf32> -> vector<12x128xf32>
    %50 = arith.addf %46, %49 : vector<12x128xf32>
    %51 = vector.extract_strided_slice %41 {offsets = [0, 0], sizes = [16, 128], strides = [1, 1]} : vector<16x256xbf16> to vector<16x128xbf16>
    %c0_19 = arith.constant 0 : index
    %c32 = arith.constant 32 : index
    %52 = vector.load %arg4[%c0_19, %c32] : memref<12x144xbf16, #tpu.memory_space<vmem>>, vector<12x16xbf16>
    %cst_20 = arith.constant dense<0.000000e+00> : vector<12x128xf32>
    %53 = tpu.matmul %52, %51, %cst_20 {dimension_numbers = #tpu.dot_dimension_numbers<[1], [0], [0], [1], [0, 0, 1, 1], [], []>} : vector<12x16xbf16>, vector<16x128xbf16>, vector<12x128xf32> -> vector<12x128xf32>
    %54 = arith.addf %50, %53 : vector<12x128xf32>
    %55 = vector.extract_strided_slice %39 {offsets = [0, 16], sizes = [16, 128], strides = [1, 1]} : vector<16x256xbf16> to vector<16x128xbf16>
    %c0_21 = arith.constant 0 : index
    %c48 = arith.constant 48 : index
    %56 = vector.load %arg4[%c0_21, %c48] : memref<12x144xbf16, #tpu.memory_space<vmem>>, vector<12x16xbf16>
    %cst_22 = arith.constant dense<0.000000e+00> : vector<12x128xf32>
    %57 = tpu.matmul %56, %55, %cst_22 {dimension_numbers = #tpu.dot_dimension_numbers<[1], [0], [0], [1], [0, 0, 1, 1], [], []>} : vector<12x16xbf16>, vector<16x128xbf16>, vector<12x128xf32> -> vector<12x128xf32>
    %58 = arith.addf %54, %57 : vector<12x128xf32>
    %59 = vector.extract_strided_slice %40 {offsets = [0, 16], sizes = [16, 128], strides = [1, 1]} : vector<16x256xbf16> to vector<16x128xbf16>
    %c0_23 = arith.constant 0 : index
    %c64 = arith.constant 64 : index
    %60 = vector.load %arg4[%c0_23, %c64] : memref<12x144xbf16, #tpu.memory_space<vmem>>, vector<12x16xbf16>
    %cst_24 = arith.constant dense<0.000000e+00> : vector<12x128xf32>
    %61 = tpu.matmul %60, %59, %cst_24 {dimension_numbers = #tpu.dot_dimension_numbers<[1], [0], [0], [1], [0, 0, 1, 1], [], []>} : vector<12x16xbf16>, vector<16x128xbf16>, vector<12x128xf32> -> vector<12x128xf32>
    %62 = arith.addf %58, %61 : vector<12x128xf32>
    %63 = vector.extract_strided_slice %41 {offsets = [0, 16], sizes = [16, 128], strides = [1, 1]} : vector<16x256xbf16> to vector<16x128xbf16>
    %c0_25 = arith.constant 0 : index
    %c80 = arith.constant 80 : index
    %64 = vector.load %arg4[%c0_25, %c80] : memref<12x144xbf16, #tpu.memory_space<vmem>>, vector<12x16xbf16>
    %cst_26 = arith.constant dense<0.000000e+00> : vector<12x128xf32>
    %65 = tpu.matmul %64, %63, %cst_26 {dimension_numbers = #tpu.dot_dimension_numbers<[1], [0], [0], [1], [0, 0, 1, 1], [], []>} : vector<12x16xbf16>, vector<16x128xbf16>, vector<12x128xf32> -> vector<12x128xf32>
    %66 = arith.addf %62, %65 : vector<12x128xf32>
    %67 = vector.extract_strided_slice %39 {offsets = [0, 32], sizes = [16, 128], strides = [1, 1]} : vector<16x256xbf16> to vector<16x128xbf16>
    %c0_27 = arith.constant 0 : index
    %c96 = arith.constant 96 : index
    %68 = vector.load %arg4[%c0_27, %c96] : memref<12x144xbf16, #tpu.memory_space<vmem>>, vector<12x16xbf16>
    %cst_28 = arith.constant dense<0.000000e+00> : vector<12x128xf32>
    %69 = tpu.matmul %68, %67, %cst_28 {dimension_numbers = #tpu.dot_dimension_numbers<[1], [0], [0], [1], [0, 0, 1, 1], [], []>} : vector<12x16xbf16>, vector<16x128xbf16>, vector<12x128xf32> -> vector<12x128xf32>
    %70 = arith.addf %66, %69 : vector<12x128xf32>
    %71 = vector.extract_strided_slice %40 {offsets = [0, 32], sizes = [16, 128], strides = [1, 1]} : vector<16x256xbf16> to vector<16x128xbf16>
    %c0_29 = arith.constant 0 : index
    %c112 = arith.constant 112 : index
    %72 = vector.load %arg4[%c0_29, %c112] : memref<12x144xbf16, #tpu.memory_space<vmem>>, vector<12x16xbf16>
    %cst_30 = arith.constant dense<0.000000e+00> : vector<12x128xf32>
    %73 = tpu.matmul %72, %71, %cst_30 {dimension_numbers = #tpu.dot_dimension_numbers<[1], [0], [0], [1], [0, 0, 1, 1], [], []>} : vector<12x16xbf16>, vector<16x128xbf16>, vector<12x128xf32> -> vector<12x128xf32>
    %74 = arith.addf %70, %73 : vector<12x128xf32>
    %75 = vector.extract_strided_slice %41 {offsets = [0, 32], sizes = [16, 128], strides = [1, 1]} : vector<16x256xbf16> to vector<16x128xbf16>
    %c0_31 = arith.constant 0 : index
    %c128 = arith.constant 128 : index
    %76 = vector.load %arg4[%c0_31, %c128] : memref<12x144xbf16, #tpu.memory_space<vmem>>, vector<12x16xbf16>
    %cst_32 = arith.constant dense<0.000000e+00> : vector<12x128xf32>
    %77 = tpu.matmul %76, %75, %cst_32 {dimension_numbers = #tpu.dot_dimension_numbers<[1], [0], [0], [1], [0, 0, 1, 1], [], []>} : vector<12x16xbf16>, vector<16x128xbf16>, vector<12x128xf32> -> vector<12x128xf32>
    %78 = arith.addf %74, %77 : vector<12x128xf32>
    %c0_33 = arith.constant 0 : index
    %c0_34 = arith.constant 0 : index
    %79 = vector.load %arg5[%c0_33, %c0_34] : memref<12x1xf32, #tpu.memory_space<vmem>>, vector<12x1xf32>
    %80 = vector.broadcast %79 : vector<12x1xf32> to vector<12x128xf32>
    %81 = arith.addf %78, %80 : vector<12x128xf32>
    %cst_35 = arith.constant 0.000000e+00 : f32
    %82 = vector.broadcast %cst_35 : f32 to vector<12x128xf32>
    %83 = arith.maximumf %81, %82 : vector<12x128xf32>
    %c0_36 = arith.constant 0 : index
    %c0_37 = arith.constant 0 : index
    %84 = vector.load %arg6[%c0_36, %c0_37] : memref<5x12xbf16, #tpu.memory_space<vmem>>, vector<5x12xbf16>
    %85 = arith.truncf %83 : vector<12x128xf32> to vector<12x128xbf16>
    %cst_38 = arith.constant dense<0.000000e+00> : vector<5x128xf32>
    %86 = tpu.matmul %84, %85, %cst_38 {dimension_numbers = #tpu.dot_dimension_numbers<[1], [0], [0], [1], [0, 0, 1, 1], [], []>} : vector<5x12xbf16>, vector<12x128xbf16>, vector<5x128xf32> -> vector<5x128xf32>
    %c0_39 = arith.constant 0 : index
    %c0_40 = arith.constant 0 : index
    %87 = vector.load %arg7[%c0_39, %c0_40] : memref<5x1xf32, #tpu.memory_space<vmem>>, vector<5x1xf32>
    %88 = vector.broadcast %87 : vector<5x1xf32> to vector<5x128xf32>
    %89 = arith.addf %86, %88 : vector<5x128xf32>
    %90 = vector.shape_cast %89 : vector<5x128xf32> to vector<1x5x128xf32>
    %c0_41 = arith.constant 0 : index
    %c0_42 = arith.constant 0 : index
    %c0_43 = arith.constant 0 : index
    %91 = vector.load %arg8[%c0_41, %c0_42, %c0_43] : memref<1x5x128xf32, #tpu.memory_space<vmem>>, vector<1x5x128xf32>
    tpu.vector_store %arg8[%c0_41, %c0_42, %c0_43], %90 {strides = array<i32>} : memref<1x5x128xf32, #tpu.memory_space<vmem>>, vector<1x5x128xf32>,
    return
  }
  func.func @transform_0(%arg0: i32, %arg1: i32) -> (i32, i32, i32) {
    %c0_i32 = arith.constant 0 : i32
    %c0_i32_0 = arith.constant 0 : i32
    return %arg0, %c0_i32, %arg1 : i32, i32, i32
  }
  func.func @transform_1(%arg0: i32, %arg1: i32) -> (i32, i32, i32, i32) {
    %c0_i32 = arith.constant 0 : i32
    %c0_i32_0 = arith.constant 0 : i32
    %c0_i32_1 = arith.constant 0 : i32
    return %arg0, %arg1, %c0_i32, %c0_i32_0 : i32, i32, i32, i32
  }
  func.func @transform_2(%arg0: i32, %arg1: i32) -> (i32, i32) {
    %c0_i32 = arith.constant 0 : i32
    %c0_i32_0 = arith.constant 0 : i32
    %c0_i32_1 = arith.constant 0 : i32
    return %c0_i32, %c0_i32_0 : i32, i32
  }
  func.func @transform_3(%arg0: i32, %arg1: i32) -> (i32, i32) {
    %c0_i32 = arith.constant 0 : i32
    %c0_i32_0 = arith.constant 0 : i32
    %c0_i32_1 = arith.constant 0 : i32
    return %c0_i32, %c0_i32_0 : i32, i32
  }
  func.func @transform_4(%arg0: i32, %arg1: i32) -> (i32, i32) {
    %c0_i32 = arith.constant 0 : i32
    %c0_i32_0 = arith.constant 0 : i32
    %c0_i32_1 = arith.constant 0 : i32
    return %c0_i32, %c0_i32_0 : i32, i32
  }
  func.func @transform_5(%arg0: i32, %arg1: i32) -> (i32, i32) {
    %c0_i32 = arith.constant 0 : i32
    %c0_i32_0 = arith.constant 0 : i32
    %c0_i32_1 = arith.constant 0 : i32
    return %c0_i32, %c0_i32_0 : i32, i32
  }
  func.func @transform_6(%arg0: i32, %arg1: i32) -> (i32, i32, i32) {
    %c0_i32 = arith.constant 0 : i32
    %c0_i32_0 = arith.constant 0 : i32
    return %arg0, %c0_i32, %arg1 : i32, i32, i32
  }
}

</mosaic_0001>

<bundles_post_ra>
// kernel: tpu_custom_call.1
= control target key start
LH: loop header
LB: loop body
LE: loop exit
PB: predicated region body
PF: predicated region fallthrough
CT: control target
= control target key end

     0   :  { %s1891_s0 = inlined_call_operand.hbm [shape: f32[2,16,256], index: 0, kind: input, shape index: {}]   ;;  %s1892_s1 = inlined_call_operand.hbm [shape: f32[2,2,16,32], index: 1, kind: input, shape index: {}]   ;;  %s1893_s2 = inlined_call_operand.vmem [shape: bf16[12,144], index: 2, kind: input, shape index: {}]   ;;  %s1894_s3 = inlined_call_operand.vmem [shape: f32[12,1], index: 3, kind: input, shape index: {}]   ;;  %s1895_s4 = inlined_call_operand.vmem [shape: bf16[5,12], index: 4, kind: input, shape index: {}]   ;;  %s1896_s5 = inlined_call_operand.vmem [shape: f32[5,1], index: 5, kind: input, shape index: {}]   ;;  %s1897_s6 = inlined_call_operand.vmem [shape: f32[2,5,256], index: 6, kind: output, shape index: {}]  }
   0x1   :  { %1902 = sst [smem:[#allocation12_spill]] %s1891_s0 }
   0x2   :  { %1903 = sst [smem:[#allocation13_spill]] %s1897_s6 }
   0x3   :  { %11 = vsyncpa [#allocation3], 0 }
   0x4   :  { %13 = vsyncpa [#allocation3 + $0x1], 0 }
   0x5   :  { %14 = vsyncpa [#allocation5], 0 }
   0x6   :  { %16 = vsyncpa [#allocation5 + $0x1], 0  ;;  %s1534_s21 = smov 0   ;;  %s1536_s22 = smov 0  }
   0x7   :  { %s1538_s23 = smov 0   ;;  %s1540_s24 = smov 0  }
   0x8   :  { %s1542_s25 = smov 0   ;;  %s1544_s26 = smov 0  }
   0x9   :  { %s1546_s27 = smov 0   ;;  %s1548_s28 = smov 0  }
   0xa LB: > { %1904 = sst [smem:[#allocation8_spill]] %s1460_s23  ;;  %s1114_s29 = sadd.s32 4294967295, %s1480_s28   ;;  %s1480_s28 = sphi %s1548_s28, %s22_s28   ;;  %s1476_s27 = sphi %s1546_s27, %s1934_s27   ;;  %s1472_s26 = sphi %s1544_s26, %s1933_s26   ;;  %s1468_s25 = sphi %s1542_s25, %s1932_s25   ;;  %s1464_s24 = sphi %s1540_s24, %s1931_s24   ;;  %s1460_s23 = sphi %s1538_s23, %s1930_s23   ;;  %s1456_s22 = sphi %s1536_s22, %s1929_s22   ;;  %s1452_s21 = sphi %s1534_s21, %s1928_s21  }
   0xb   : > { %s31_s30 = sadd.s32 1, %s1472_s26  ;;  %s34_s7 = sadd.s32 1, %s1476_s27 }
   0xc   : > { %p32_p0 = scmp.ge.s32.totalorder %s31_s30, 2  ;;  %s43_s8 = sadd.s32 1, %s1460_s23 }
   0xd   : > { %p50_p1 = scmp.ne.s32.totalorder %s1460_s23, %s1456_s22  ;;  %p51_p2 = scmp.eq.s32.totalorder %s1480_s28, 0 }
   0xe   : > { %s1936_s30 = smov (%p32_p0, %s31_s30), 0  ;;  %s1938_s7 = smov (!%p32_p0, %s34_s7), %s1476_s27 }
   0xf   : > { %1905 = sst [smem:[#allocation9_spill]] %s1936_s30  ;;  %s39_s9 = ssub.s32 %s1472_s26, %s1936_s30 }
  0x10   : > { %p36_p3 = scmp.ge.s32.totalorder %s1938_s7, 2  ;;  %p56_p4 = scmp.ne.s32.totalorder %s1456_s22, %s1452_s21 }
  0x11   : > { %p1585_p5 = por %p51_p2, %p50_p1  ;;  %p57_p6 = scmp.eq.s32.totalorder %s1114_s29, 0 }
  0x12   : > { %s1940_s7 = smov (%p36_p3, %s1938_s7), 0  ;;  %p1241_p8 = scmp.lt.s32.totalorder %s1480_s28, 4 }
  0x13   : > { %1907 = sst [smem:[#allocation10_spill]] %s1940_s7  ;;  %p1591_p7 = por %p57_p6, %p56_p4 }
  0x14   : > { %s38_s12 = ssub.s32 %s1476_s27, %s1940_s7  ;;  %s1599_s14 = sand.u32 1, %s1460_s23  }
  0x15   : > { %s1908_s11 = scalar_select %p1591_p7, 1, 0 }
  0x16   : > { %s40_s13 = sor.u32 %s39_s9, %s38_s12  ;;  %s1118_s15 = sshll.u32 %s1599_s14, 4 }
  0x17   : > { %p41_p9 = scmp.eq.s32.totalorder %s40_s13, 0  ;;  %s1119_s16 = sshll.u32 %s1476_s27, 2 }
  0x18   : > { %s241_s18 = sadd.s32 %s1472_s26, %s1119_s16  ;;  %s236_s20 = scalar_lea.vmem [#allocation2], %s1118_s15 }
  0x19   : > { %s1604_s17 = scalar_select %p41_p9, %s1460_s23, %s43_s8  }
  0x1a   : > { %s1120_s19 = sshll.u32 %s241_s18, 7  ;;  %s244_s21 = sshll.u32 %s236_s20, 4  ;;  %s1616_s21 = int_to_ptr.vmem [resolvable:$true] %s244_s21 }
  0x1b   : > { %1909 = sst [smem:[#allocation11_spill]] %s1604_s17  ;;  %s1910_s0 = sld [smem:[#allocation12_spill]] }
  0x1c   : > { %p1622_p10 = pnand %p1241_p8, %p1585_p5  ;;  %s233_s12 = scalar_lea.sflag [#allocation3], %s1599_s14 }
  0x1e   : > { %p1352_p13 = pneg %p1622_p10 }
  0x21   : > { %s1614_s9 = scalar_lea.hbm %s1910_s0, %s1120_s19  ;;  %s1355_s10 = scalar_lea.hbm %s1910_s0, 1024 }
  0x22   : > { %s1350_s13 = scalar_lea.hbm %s1614_s9, 256  ;;  %p1356_p2 = scmp.lt.u32.totalorder %s1614_s9, %s1910_s0 }
  0x23   : > { %p1351_p12 = scmp.ne.s32.totalorder %s1614_s9, %s1350_s13  ;;  %p1357_p3 = scmp.lt.u32.totalorder %s1355_s10, %s1350_s13 }
  0x24   : > { %p1359_p5 = scmp.lt.u32.totalorder %s1350_s13, %s1614_s9 }
  0x25   : > { %p1353_p0 = pnand %p1352_p13, %p1351_p12  ;;  %p1358_p4 = por %p1357_p3, %p1356_p2 }
  0x27   : > { %p1354_p1 = pneg %p1353_p0  ;;  %p1360_p6 = por %p1359_p5, %p1358_p4 }
  0x29   : > { %p1361_p8 = pnand %p1360_p6, %p1354_p1 }
  0x2b   : > { %1364 = shalt.err (!%p1361_p8)
}
  0x2c   : > { %s1365_s29 = scalar_lea.vmem %s1616_s21, 256  ;;  %s1482_s7 = smov [#allocation2]  }
  0x2d   : > { %p1366_p9 = scmp.ne.s32.totalorder %s1616_s21, %s1365_s29  ;;  %s1370_s18 = sshll.u32 %s1482_s7, 4  ;;  %s1371_s18 = int_to_ptr.vmem [resolvable:$false] %s1370_s18 }
  0x2e   : > { %s1372_s19 = scalar_lea.vmem %s1371_s18, 512  ;;  %p1373_p11 = scmp.lt.s32.totalorder %s1616_s21, %s1371_s18 }
  0x2f   : > { %p1368_p12 = pnand %p1366_p9, %p1352_p13  ;;  %p1374_p2 = scmp.lt.s32.totalorder %s1372_s19, %s1365_s29 }
  0x31   : > { %p1369_p0 = pneg %p1368_p12  ;;  %p1375_p3 = por %p1374_p2, %p1373_p11 }
  0x33   : > { %p1376_p4 = pnand %p1375_p3, %p1369_p0 }
  0x35   : > { %1379 = shalt.err (!%p1376_p4)
}
  0x36   : > { %s1483_s13 = smov 256   ;;  %s1484_s10 = smov 128  }
  0x37   : > { %s1485_s20 = smov 8   ;;  %p275_p11 = scmp.lt.s32.totalorder %s1480_s28, 5 }
  0x38   : > { %1237 = dma.hbm_to_vmem [thread:$0]  (!%p1622_p10), %s1614_s9, 256, %s1616_s21, %s233_s12, %s1483_s13, %s1484_s10, %s1485_s20  }
  0x39   : > { %s1122_s29 = sshll.u32 %s1472_s26, 1  ;;  %p1912_p1 = scmp.ge.s32.totalorder %s1480_s28, 1 }
  0x3a   : > { %s264_s18 = sadd.s32 %s1122_s29, %s1119_s16  ;;  %s258_s0 = scalar_lea.vmem [#allocation4], %s1118_s15 }
  0x3b   : > { %p1661_p5 = pnand %p1912_p1, %p275_p11  ;;  %s1124_s19 = sshll.u32 %s264_s18, 7 }
  0x3c   : > { %s267_s30 = sshll.u32 %s258_s0, 4  ;;  %s1672_s6 = scalar_lea.hbm %s1892_s1, %s1124_s19  ;;  %s1674_s30 = int_to_ptr.vmem [resolvable:$true] %s267_s30 }
  0x3d   : > { %s255_s21 = scalar_lea.sflag [#allocation5], %s1599_s14  ;;  %s1380_s9 = scalar_lea.hbm %s1672_s6, 256 }
  0x3e   : > { %p1381_p6 = scmp.ne.s32.totalorder %s1672_s6, %s1380_s9  ;;  %s1385_s16 = scalar_lea.hbm %s1892_s1, 1024 }
  0x3f   : > { %p1386_p12 = scmp.lt.u32.totalorder %s1672_s6, %s1892_s1  ;;  %p1387_p0 = scmp.lt.u32.totalorder %s1385_s16, %s1380_s9 }
  0x40   : > { %p1383_p8 = pnand %p1381_p6, %p1352_p13  ;;  %p1389_p3 = scmp.lt.u32.totalorder %s1380_s9, %s1672_s6 }
  0x41   : > { %p1388_p2 = por %p1387_p0, %p1386_p12 }
  0x42   : > { %p1384_p9 = pneg %p1383_p8 }
  0x43   : > { %p1390_p4 = por %p1389_p3, %p1388_p2 }
  0x45   : > { %p1391_p11 = pnand %p1390_p4, %p1384_p9 }
  0x47   : > { %1394 = shalt.err (!%p1391_p11)
}
  0x48   : > { %s1395_s12 = scalar_lea.vmem %s1674_s30, 256  ;;  %s1486_s13 = smov [#allocation4]  }
  0x49   : > { %p1396_p1 = scmp.ne.s32.totalorder %s1674_s30, %s1395_s12  ;;  %s1400_s29 = sshll.u32 %s1486_s13, 4  ;;  %s1401_s29 = int_to_ptr.vmem [resolvable:$false] %s1400_s29 }
  0x4a   : > { %s1402_s18 = scalar_lea.vmem %s1401_s29, 512  ;;  %p1403_p7 = scmp.lt.s32.totalorder %s1674_s30, %s1401_s29 }
  0x4b   : > { %p1398_p6 = pnand %p1396_p1, %p1352_p13  ;;  %p1404_p12 = scmp.lt.s32.totalorder %s1402_s18, %s1395_s12 }
  0x4d   : > { %p1399_p8 = pneg %p1398_p6  ;;  %p1405_p0 = por %p1404_p12, %p1403_p7 }
  0x4f   : > { %p1406_p2 = pnand %p1405_p0, %p1399_p8 }
  0x51   : > { %1409 = shalt.err (!%p1406_p2)
}
  0x52   : > { %1240 = dma.hbm_to_vmem [thread:$0]  (!%p1622_p10), %s1672_s6, 256, %s1674_s30, %s255_s21, %s1484_s10, %s1484_s10, %s1485_s20  }
  0x53   : > { %279 = sbr.rel (%p1661_p5) target bundleno = 919 (0x397), region = 44  ;;  %s281_s19 = sand.u32 (!%p1661_p5), 1, %s1456_s22  }
  0x54   : > { %s1126_s9 = sshll.u32 (!%p1661_p5), %s281_s19, 4  ;;  %s282_s15 = scalar_lea.sflag (!%p1661_p5), [#allocation3], %s281_s19 }
  0x55   : > { %s285_s0 = scalar_lea.vmem (!%p1661_p5), [#allocation2], %s1126_s9  ;;  %p1914_p7 = scmp.ne.s32.totalorder (!%p1661_p5), %s1908_s11, 0 }
  0x5a   : > { %1443 = dma.done.wait (%p1914_p7), %s282_s15, 256  }
  0x5b   : > { %1445 = vsyncadd (%p1914_p7), %s282_s15, 4294967040  ;;  %s291_s8 = scalar_lea.sflag [#allocation5], %s281_s19  ;;  %s294_s14 = scalar_lea.vmem [#allocation4], %s1126_s9 }
  0x5c   : > { %1447 = dma.done.wait (%p1914_p7), %s291_s8, 256  }
  0x5d   : > { %1449 = vsyncadd (%p1914_p7), %s291_s8, 4294967040  ;;  %v1487_v0 = vmov 0.0   ;;  %v340_v1 = vld [vmem:[%s285_s0] sm:$0xff]  ;;  %v341_v2 = vld [vmem:[%s285_s0 + $0x8] sm:$0xff]  ;;  %s1488_s6 = smov 16   ;;  %vm352_vm0 = vcmask 130048   ;;  %v360_v20 = vlaneseq }
  0x5e   : > { %1170 = vmatprep.subr.bf16.mxu0 %v1487_v0  ;;  %1176 = vmatprep.subr.bf16.mxu1 %v1487_v0  ;;  %v1321_v3 = vpack.i.bf16 %v341_v2, %v340_v1  ;;  %v342_v5 = vld [vmem:[%s294_s14] sm:$0xff]  ;;  %v343_v6 = vld [vmem:[%s294_s14 + $0x8] sm:$0xff]  ;;  %vm357_vm1 = vcmask 261120   ;;  %vm1489_vm2 = vmmov 0   ;;  %s1490_s30 = smov 1   ;;  %s1491_s11 = smov 127  }
  0x5f   : > { %1172 = vmatprep.mubr.msk.bf16.mxu0 %vm1489_vm2, %v1487_v0  ;;  %1178 = vmatprep.mubr.msk.bf16.mxu1 %vm1489_vm2, %v1487_v0  ;;  %v1734_v18 = vld [vmem:[%s1893_s2] ss:$8 sps:$4 sm:$0x3f]   ;;  %s1492_s7 = smov 96   ;;  %s1493_s21 = smov 112   ;;  %v361_v21 = vand.u32 127, %v360_v20 }
  0x60   : > { %1322 = vrot.lane.b32.xlu0 %v1321_v3, %s1488_s6  ;;  %s1494_s16 = smov 64   ;;  %s1495_s23 = smov 80   ;;  %vm592_vm11 = vcmask 916480   ;;  %vm759_vm12 = vcmask 785408   ;;  %vm949_vm13 = vcmask 1045504   ;;  %vm945_vm14 = vcmask 97280  }
  0x61   : > { %s1496_s17 = smov 48   ;;  %v362_v22 = vadd.s32 128, %v361_v21  ;;  %v367_v23 = vand.u32 15, %v361_v21  ;;  %vm397_vm4 = vcmp.lt.s32.totalorder %v361_v21, 1  ;;  %vm420_vm6 = vcmp.lt.s32.totalorder %v361_v21, 127  ;;  %s1497_s12 = smov 32  }
  0x62   : > { %v1349_v29 = vld [vmem:[%s1893_s2 + $0x4] ss:$8 sps:$4 sm:$0x3f]   ;;  %p331_p10 = scmp.lt.s32.totalorder %s1468_s25, 1  ;;  %p333_p13 = scmp.lt.s32.totalorder %s1464_s24, 1 }
  0x63   : > { %v374_v24 = vand.u32 15, %v362_v22  ;;  %vm1749_vm3 = vcmp.gt.s32.totalorder %v367_v23, 0  ;;  %vm1757_vm7 = vcmp.lt.s32.totalorder %v367_v23, 15 }
  0x64   : > { %vm1132_vm8 = vmpackc.low %vm1749_vm3, %vm1749_vm3  ;;  %s1942_s25 = smov (!%p331_p10, %s1468_s25), 1  ;;  %s1944_s24 = smov (!%p333_p13, %s1464_s24), 1 }
  0x65   : > { %vm1753_vm5 = vcmp.gt.s32.totalorder %v374_v24, 0  ;;  %vm1772_vm9 = vcmp.lt.s32.totalorder %v374_v24, 15  ;;  %vm1136_vm10 = vmpackc.low %vm1757_vm7, %vm1757_vm7 }
  0xd2   : > { %v1323_v4 = vpop.permute.xlu0 %1322 }
  0xd3   : > { %v1325_v7 = vunpack.i.h.bf16 %v1323_v4  ;;  %v1324_v8 = vunpack.i.l.bf16 %v1323_v4 }
  0xd5   : > { %v353_v9 = vsel %vm352_vm0, %v342_v5, %v1324_v8  ;;  %v354_v10 = vsel %vm352_vm0, %v343_v6, %v1325_v7  ;;  %v355_v11 = vsel %vm352_vm0, %v1324_v8, %v342_v5  ;;  %v356_v12 = vsel %vm352_vm0, %v1325_v7, %v343_v6 }
  0xd6   : > { %v1326_v13 = vpack.i.bf16 %v354_v10, %v353_v9  ;;  %v1725_v14 = vpack.c.bf16 %v354_v10, %v353_v9  ;;  %v358_v15 = vsel %vm357_vm1, %v355_v11, 0.0  ;;  %v359_v16 = vsel %vm357_vm1, %v356_v12, 0.0  ;;  %v921_v9 = vld [vmem:[%s1894_s3] sm:$0xff]  ;;  %v922_v10 = vld [vmem:[%s1894_s3 + $0x8] sm:$0xf] }
  0xd7   : > { %v1331_v17 = vpack.i.bf16 %v359_v16, %v358_v15  ;;  %v1742_v19 = vpack.c.bf16 %v359_v16, %v358_v15  ;;  %v1498_v7 = vmov 0   ;;  %v939_v11 = vld [vmem:[%s1896_s5] sm:$0x1f] }
  0xd8   : > { %1327 = vrot.lane.b32.xlu0 %v1326_v13, %s1490_s30  ;;  %1171 = vmatpush3.bf16.msra.mxu0 %v1725_v14 }
  0xd9   : > { %1332 = vrot.lane.b32.xlu1 %v1331_v17, %s1490_s30  ;;  %1182 = vmatprep.subr.bf16.mxu0 %v1487_v0  ;;  %s1128_s30 = sshll.u32 %s1942_s25, 1 }
  0xda   : > { %1347 = vset.pattern.permute.xlu1 %v1498_v7  ;;  %1346 = vset.pattern.permute.xlu0 %v1498_v7 }
  0xdc   : > { %1342 = vrot.lane.b32.xlu0 %v1331_v17, %s1491_s11 }
  0xdd   : > { %1337 = vrot.lane.b32.xlu1 %v1326_v13, %s1491_s11  ;;  %s336_s11 = sadd.s32 %s1128_s30, %s1944_s24 }
  0xde   : > { %s1129_s10 = sshll.u32 %s336_s11, 3 }
  0xe0   : > { %536 = vrot.lane.b32.xlu0 %v1734_v18, %s1492_s7 }
  0xe1   : > { %446 = vrot.lane.b32.xlu1 %v1734_v18, %s1493_s21 }
  0xe4   : > { %641 = vrot.lane.b32.xlu0 %v1734_v18, %s1494_s16 }
  0xe5   : > { %584 = vrot.lane.b32.xlu1 %v1734_v18, %s1495_s23 }
  0xe8   : > { %647 = vrot.lane.b32.xlu0 %v1742_v19, %s1493_s21 }
  0xe9   : > { %697 = vrot.lane.b32.xlu1 %v1734_v18, %s1496_s17 }
  0xed   : > { %645 = vrot.lane.b32.xlu1 %v1725_v14, %s1493_s21 }
 0x14a   : > { %v1328_v25 = vpop.permute.xlu0 %1327 }
 0x14b   : > { %v1330_v26 = vunpack.i.h.bf16 %v1328_v25  ;;  %v1329_v27 = vunpack.i.l.bf16 %v1328_v25  ;;  %v1333_v28 = vpop.permute.xlu1 %1332 }
 0x14c   : > { %v1335_v30 = vunpack.i.h.bf16 %v1333_v28  ;;  %v1334_v31 = vunpack.i.l.bf16 %v1333_v28 }
 0x14e   : > { %v1343_v34 = vpop.permute.xlu0 %1342  ;;  %v400_v35 = vsel %vm397_vm4, %v1334_v31, %v1329_v27  ;;  %v401_v36 = vsel %vm397_vm4, %v1335_v30, %v1330_v26  ;;  %v398_v37 = vsel %vm397_vm4, %v1329_v27, %v1334_v31  ;;  %v399_v38 = vsel %vm397_vm4, %v1330_v26, %v1335_v30 }
 0x14f   : > { %v1345_v39 = vunpack.i.h.bf16 %v1343_v34  ;;  %v1344_v40 = vunpack.i.l.bf16 %v1343_v34  ;;  %v1338_v41 = vpop.permute.xlu1 %1337  ;;  %v1133_v42 = vpack.c.bf16 %v401_v36, %v400_v35  ;;  %v407_v43 = vsel %vm1753_vm5, %v398_v37, 0.0 }
 0x150   : > { %v1340_v44 = vunpack.i.h.bf16 %v1338_v41  ;;  %v1339_v45 = vunpack.i.l.bf16 %v1338_v41  ;;  %v409_v46 = vsel %vm1753_vm5, %v399_v38, 0.0  ;;  %v406_v47 = vsel %vm1749_vm3, %v400_v35, 0.0 }
 0x151   : > { %1177 = vmatpush3.bf16.msk.msra.mxu1 %vm1132_vm8, %v1133_v42  ;;  %v434_v48 = vpack.c.bf16 %v409_v46, %v407_v43  ;;  %v408_v49 = vsel %vm1749_vm3, %v401_v36, 0.0 }
 0x152   : > { %v421_v51 = vsel %vm420_vm6, %v1339_v45, %v1344_v40  ;;  %v422_v52 = vsel %vm420_vm6, %v1340_v44, %v1345_v39  ;;  %v433_v53 = vpack.c.bf16 %v408_v49, %v406_v47  ;;  %v423_v54 = vsel %vm420_vm6, %v1344_v40, %v1339_v45  ;;  %1188 = vmatprep.subr.bf16.mxu1 %v1487_v0  ;;  %v537_v56 = vpop.permute.xlu0 %536 }
 0x153   : > { %v1137_v55 = vpack.c.bf16 %v422_v52, %v421_v51  ;;  %590 = vrot.lane.b32.xlu0 %v434_v48, %s1493_s21  ;;  %v447_v57 = vpop.permute.xlu1 %446  ;;  %v429_v58 = vsel %vm1757_vm7, %v421_v51, 0.0  ;;  %v431_v59 = vsel %vm1757_vm7, %v422_v52, 0.0  ;;  %v424_v60 = vsel %vm420_vm6, %v1345_v39, %v1340_v44 }
 0x154   : > { %588 = vrot.lane.b32.xlu1 %v433_v53, %s1493_s21  ;;  %1173 = vmatmul.mubr.msk.bf16.vlgmr.msra.gmra.mrb[0].mxu0 %vm352_vm0, %v447_v57  ;;  %v437_v61 = vpack.c.bf16 %v431_v59, %v429_v58  ;;  %v430_v62 = vsel %vm1772_vm9, %v423_v54, 0.0  ;;  %v432_v63 = vsel %vm1772_vm9, %v424_v60, 0.0 }
 0x155   : > { %1183 = vmatpush3.bf16.msk.msra.mxu0 %vm1136_vm10, %v1137_v55  ;;  %1184 = vmatprep.mubr.msk.bf16.mxu0 %vm1489_vm2, %v1487_v0  ;;  %v438_v3 = vpack.c.bf16 %v432_v63, %v430_v62 }
 0x156   : > { %1194 = vmatprep.subr.bf16.mxu0 %v1487_v0  ;;  %1179 = vmatmul.mubr.msk.bf16.vlgmr.msra.gmra.mrb[0].mxu1 %vm352_vm0, %v1734_v18  ;;  %v642_v2 = vpop.permute.xlu0 %641 }
 0x157   : > { %753 = vrot.lane.b32.xlu0 %v1734_v18, %s1497_s12  ;;  %v585_v1 = vpop.permute.xlu1 %584  ;;  %1190 = vmatprep.mubr.msk.bf16.mxu1 %vm1489_vm2, %v1487_v0 }
 0x158   : > { %701 = vrot.lane.b32.xlu1 %v437_v61, %s1493_s21 }
 0x15a   : > { %v648_v5 = vpop.permute.xlu0 %647 }
 0x15b   : > { %703 = vrot.lane.b32.xlu0 %v438_v3, %s1493_s21  ;;  %v698_v4 = vpop.permute.xlu1 %697  ;;  %s1923_s21 = sld [smem:[#allocation13_spill]] }
 0x15c   : > { %755 = vrot.lane.b32.xlu1 %v433_v53, %s1492_s7  ;;  %1185 = vmatmul.mubr.msk.bf16.vlgmr.msra.gmra.mrb[4].mxu0 %vm352_vm0, %v537_v56 }
 0x15d   : > { %1196 = vmatprep.mubr.msk.bf16.mxu0 %vm1489_vm2, %v1487_v0 }
 0x15f   : > { %757 = vrot.lane.b32.xlu0 %v434_v48, %s1492_s7  ;;  %v646_v6 = vpop.permute.xlu1 %645 }
 0x160   : > { %810 = vrot.lane.b32.xlu1 %v1725_v14, %s1492_s7  ;;  %v649_v8 = vsel %vm592_vm11, %v646_v6, %v648_v5 }
 0x161   : > { %1195 = vmatpush3.bf16.msra.mxu0 %v649_v8  ;;  %s338_s16 = scalar_lea.vmem %s1923_s21, %s1129_s10 }
 0x162   : > { %1206 = vmatprep.subr.bf16.mxu0 %v1487_v0 }
 0x163   : > { %812 = vrot.lane.b32.xlu0 %v1742_v19, %s1492_s7 }
 0x164   : > { %869 = vrot.lane.b32.xlu1 %v437_v61, %s1492_s7  ;;  %1197 = vmatmul.mubr.msk.bf16.vlgmr.msra.gmra.mrb[8].mxu0 %vm352_vm0, %v642_v2 }
 0x165   : > { %1208 = vmatprep.mubr.msk.bf16.mxu0 %vm1489_vm2, %v1487_v0 }
 0x167   : > { %871 = vrot.lane.b32.xlu0 %v438_v3, %s1492_s7 }
 0x168   : > { %808 = vrot.lane.b32.xlu1 %v1734_v18, %s1488_s6 }
 0x16b   : > { %925 = vperm.xlu0 %1346, %v921_v9  }
 0x16c   : > { %930 = vperm.xlu1 %1347, %v922_v10  }
 0x170   : > { %942 = vperm.xlu1 %1347, %v939_v11  }
 0x1c5   : > { %v591_v12 = vpop.permute.xlu0 %590 }
 0x1c6   : > { %v589_v13 = vpop.permute.xlu1 %588 }
 0x1c7   : > { %v593_v14 = vsel %vm592_vm11, %v589_v13, %v591_v12 }
 0x1c8   : > { %1189 = vmatpush3.bf16.msra.mxu1 %v593_v14 }
 0x1c9   : > { %v754_v15 = vpop.permute.xlu0 %753  ;;  %1200 = vmatprep.subr.bf16.mxu1 %v1487_v0 }
 0x1ca   : > { %v702_v16 = vpop.permute.xlu1 %701 }
 0x1cb   : > { %1191 = vmatmul.mubr.msk.bf16.vlgmr.msra.gmra.mrb[4].mxu1 %vm352_vm0, %v585_v1 }
 0x1cc   : > { %1202 = vmatprep.mubr.msk.bf16.mxu1 %vm1489_vm2, %v1487_v0 }
 0x1cd   : > { %v704_v17 = vpop.permute.xlu0 %703 }
 0x1ce   : > { %v705_v18 = vsel %vm592_vm11, %v702_v16, %v704_v17  ;;  %v756_v19 = vpop.permute.xlu1 %755 }
 0x1cf   : > { %1201 = vmatpush3.bf16.msra.mxu1 %v705_v18 }
 0x1d0   : > { %1212 = vmatprep.subr.bf16.mxu1 %v1487_v0 }
 0x1d1   : > { %v758_v20 = vpop.permute.xlu0 %757 }
 0x1d2   : > { %v760_v21 = vsel %vm759_vm12, %v756_v19, %v758_v20  ;;  %v811_v22 = vpop.permute.xlu1 %810 }
 0x1d3   : > { %1203 = vmatmul.mubr.msk.bf16.vlgmr.msra.gmra.mrb[8].mxu1 %vm352_vm0, %v698_v4  ;;  %1207 = vmatpush3.bf16.msra.mxu0 %v760_v21 }
 0x1d4   : > { %1214 = vmatprep.mubr.msk.bf16.mxu1 %vm1489_vm2, %v1487_v0  ;;  %1218 = vmatprep.subr.bf16.mxu0 %v1487_v0 }
 0x1d5   : > { %v813_v23 = vpop.permute.xlu0 %812 }
 0x1d6   : > { %v814_v24 = vsel %vm759_vm12, %v811_v22, %v813_v23  ;;  %v870_v25 = vpop.permute.xlu1 %869  ;;  %1209 = vmatmul.mubr.msk.bf16.vlgmr.msra.gmra.mrb[12].mxu0 %vm352_vm0, %v754_v15 }
 0x1d7   : > { %1213 = vmatpush3.bf16.msra.mxu1 %v814_v24  ;;  %1220 = vmatprep.mubr.msk.bf16.mxu0 %vm1489_vm2, %v1487_v0 }
 0x1d8   : > { %1224 = vmatprep.subr.bf16.mxu1 %v1487_v0 }
 0x1d9   : > { %v872_v26 = vpop.permute.xlu0 %871 }
 0x1da   : > { %v873_v27 = vsel %vm759_vm12, %v870_v25, %v872_v26  ;;  %v809_v28 = vpop.permute.xlu1 %808  ;;  %v937_v26 = vld [vmem:[%s1895_s4] sm:$0x7] }
 0x1db   : > { %1215 = vmatmul.mubr.msk.bf16.vlgmr.msra.gmra.mrb[12].mxu1 %vm352_vm0, %v809_v28  ;;  %1219 = vmatpush3.bf16.msra.mxu0 %v873_v27 }
 0x1dc   : > { %1226 = vmatprep.mubr.msk.bf16.mxu1 %vm1489_vm2, %v1487_v0 }
 0x1de   : > { %1221 = vmatmul.mubr.msk.bf16.vlgmr.msra.gmra.mrb[16].mxu0 %vm352_vm0, %v1349_v29 }
 0x1ea   : > { %v926_v10 = vpop.permute.xlu0 %925 }
 0x1eb   : > { %v931_v20 = vpop.permute.xlu1 %930 }
 0x1ef   : > { %v943_v27 = vpop.permute.xlu1 %942 }
 0x227   : > { %v485_v30 = vpop.f32.mrb[0].mxu0 }
 0x228   : > { %v1174_v31 = vpop.f32.mrb[1].mxu0 }
 0x229   : > { %v488_v32 = vpop.f32.mrb[2].mxu0  ;;  %v529_v33 = vpop.f32.mrb[0].mxu1 }
 0x22a   : > { %v1175_v34 = vpop.f32.mrb[3].mxu0  ;;  %v530_v35 = vadd.f32 %v529_v33, %v485_v30  ;;  %v1180_v36 = vpop.f32.mrb[1].mxu1 }
 0x22b   : > { %v532_v37 = vpop.f32.mrb[2].mxu1 }
 0x22c   : > { %v533_v38 = vadd.f32 %v532_v37, %v488_v32  ;;  %v1181_v39 = vpop.f32.mrb[3].mxu1 }
 0x22f   : > { %v575_v40 = vpop.f32.mrb[4].mxu0 }
 0x230   : > { %v582_v41 = vadd.f32 %v575_v40, %v530_v35  ;;  %v1186_v42 = vpop.f32.mrb[5].mxu0 }
 0x231   : > { %v578_v43 = vpop.f32.mrb[6].mxu0 }
 0x232   : > { %v583_v44 = vadd.f32 %v578_v43, %v533_v38  ;;  %v1187_v45 = vpop.f32.mrb[7].mxu0 }
 0x237   : > { %v688_v46 = vpop.f32.mrb[8].mxu0 }
 0x238   : > { %v1198_v0 = vpop.f32.mrb[9].mxu0 }
 0x239   : > { %v691_v47 = vpop.f32.mrb[10].mxu0 }
 0x23a   : > { %v1199_v48 = vpop.f32.mrb[11].mxu0 }
 0x29e   : > { %v632_v49 = vpop.f32.mrb[4].mxu1 }
 0x29f   : > { %v639_v50 = vadd.f32 %v632_v49, %v582_v41  ;;  %v1192_v51 = vpop.f32.mrb[5].mxu1 }
 0x2a0   : > { %v635_v52 = vpop.f32.mrb[6].mxu1 }
 0x2a1   : > { %v640_v53 = vadd.f32 %v635_v52, %v583_v44  ;;  %v1193_v54 = vpop.f32.mrb[7].mxu1  ;;  %v695_v55 = vadd.f32 %v688_v46, %v639_v50 }
 0x2a3   : > { %v696_v56 = vadd.f32 %v691_v47, %v640_v53 }
 0x2a6   : > { %v744_v57 = vpop.f32.mrb[8].mxu1 }
 0x2a7   : > { %v751_v58 = vadd.f32 %v744_v57, %v695_v55  ;;  %v1204_v59 = vpop.f32.mrb[9].mxu1 }
 0x2a8   : > { %v747_v60 = vpop.f32.mrb[10].mxu1 }
 0x2a9   : > { %v752_v61 = vadd.f32 %v747_v60, %v696_v56  ;;  %v1205_v62 = vpop.f32.mrb[11].mxu1  ;;  %v799_v63 = vpop.f32.mrb[12].mxu0 }
 0x2aa   : > { %v806_v1 = vadd.f32 %v799_v63, %v751_v58  ;;  %v1210_v2 = vpop.f32.mrb[13].mxu0 }
 0x2ab   : > { %v802_v3 = vpop.f32.mrb[14].mxu0 }
 0x2ac   : > { %v807_v4 = vadd.f32 %v802_v3, %v752_v61  ;;  %v1211_v5 = vpop.f32.mrb[15].mxu0 }
 0x2ae   : > { %v853_v6 = vpop.f32.mrb[12].mxu1 }
 0x2af   : > { %v860_v7 = vadd.f32 %v853_v6, %v806_v1  ;;  %v1216_v8 = vpop.f32.mrb[13].mxu1 }
 0x2b0   : > { %v856_v9 = vpop.f32.mrb[14].mxu1 }
 0x2b1   : > { %v861_v11 = vadd.f32 %v856_v9, %v807_v4  ;;  %v1217_v12 = vpop.f32.mrb[15].mxu1  ;;  %v912_v13 = vpop.f32.mrb[16].mxu0 }
 0x2b2   : > { %v919_v14 = vadd.f32 %v912_v13, %v860_v7  ;;  %v1222_v15 = vpop.f32.mrb[17].mxu0 }
 0x2b3   : > { %v915_v16 = vpop.f32.mrb[18].mxu0 }
 0x2b4   : > { %v933_v17 = vadd.f32 %v926_v10, %v919_v14  ;;  %v920_v18 = vadd.f32 %v915_v16, %v861_v11  ;;  %v1223_v19 = vpop.f32.mrb[19].mxu0 }
 0x2b6   : > { %v934_v21 = vadd.f32 %v931_v20, %v920_v18  ;;  %v935_v22 = vmax.f32 %v933_v17, 0.0 }
 0x2b8   : > { %v936_v23 = vmax.f32 %v934_v21, 0.0 }
 0x2ba   : > { %v938_v24 = vpack.c.bf16 %v936_v23, %v935_v22 }
 0x2bc   : > { %v951_v25 = vsel %vm949_vm13, %v938_v24, 0 }
 0x2bd   : > { %1225 = vmatpush3.bf16.msra.mxu1 %v951_v25 }
 0x2c0   : > { %1227 = vmatmul.mubr.msk.bf16.vlgmr.msra.gmra.mrb[16].mxu1 %vm945_vm14, %v937_v26 }
 0x393   : > { %v987_v28 = vpop.f32.mrb[16].mxu1 }
 0x394   : > { %v988_v29 = vadd.f32 %v987_v28, %v943_v27  ;;  %v1228_v30 = vpop.f32.mrb[17].mxu1 }
 0x395   : > { %v990_v31 = vpop.f32.mrb[18].mxu1 }
 0x396   : > { %993 = vst [vmem:[%s338_s16] sm:$0x1f] %v988_v29  ;;  %v1229_v32 = vpop.f32.mrb[19].mxu1 }
 0x397 PF: > { %s22_s28 = sadd.s32 1, %s1480_s28   ;;  %s1924_s23 = sld [smem:[#allocation8_spill]] }
 0x398   : > { %p19_p5 = scmp.ge.s32.totalorder %s22_s28, 6   ;;  %s1925_s25 = sld [smem:[#allocation11_spill]] }
 0x399   : > { %s1926_s17 = sld [smem:[#allocation9_spill]]  ;;  %s1927_s12 = sld [smem:[#allocation10_spill]] }
 0x39a   : > { %s1928_s21 = smov %s1456_s22  ;;  %s1931_s24 = smov %s1472_s26 }
 0x39b   :  { %21 = sbr.rel (!%p19_p5) target bundleno = 10 (0xa), region = 97 }
 0x39d   : > { %s1929_s22 = smov %s1924_s23 }
 0x39e   : > { %s1930_s23 = smov %s1925_s25  ;;  %s1932_s25 = smov %s1476_s27 }
 0x39f   : > { %s1933_s26 = smov %s1926_s17  ;;  %s1934_s27 = smov %s1927_s12 }
 0x3a2   :  { %1021 = vsyncpa [#allocation3], 1 }
 0x3a3   :  { %1023 = vsyncpa [#allocation3 + $0x1], 1 }
 0x3a4   :  { %1024 = vsyncpa [#allocation5], 1 }
 0x3a5   :  { %1026 = vsyncpa [#allocation5 + $0x1], 1 }

</bundles_post_ra>
